<compile_context>
chip_gen: v7x
topology: tpu7x:2x2x1
jax: 0.10.0
libtpu: 0.0.40
codegen_flags: <defaults>
</compile_context>

<pallas_src>
import jax
import jax.numpy as jnp
from jax.experimental import pallas as pl
from jax.experimental.pallas import tpu as pltpu


def _sublane_pack(dtype) -> int:
    """Rows per (sublane, 128) HBM tile for this dtype."""
    return max(8, 32 // jnp.dtype(dtype).itemsize)


def _split_rows(num_rows: int, max_chunks: int, pack: int):
    """Split [0, num_rows) into <= max_chunks pieces with pack-aligned
    starts (only the final piece may end unaligned)."""
    if num_rows <= 0:
        return []
    n_tiles = -(-num_rows // pack)
    n_chunks = max(1, min(max_chunks, n_tiles))
    tiles_per_chunk = -(-n_tiles // n_chunks)
    chunks, start = [], 0
    while start < num_rows:
        size = min(tiles_per_chunk * pack, num_rows - start)
        chunks.append((start, size))
        start += size
    return chunks


def concat_dim0(
    x: jax.Array,
    y: jax.Array,
    *,
    num_cores: int = 2,
    chunks_per_core: int = 4,
    small_fallback_bytes: int = 1 << 20,
) -> jax.Array:
    """torch.cat([x, y], dim=0) equivalent: pure chunked HBM->HBM DMA."""
    # Fallback paths (correctness-preserving): rank-1 inputs, tiny inputs,
    # or a seam row-offset that is not sublane-tile aligned.
    if (
        x.ndim < 2
        or x.shape[1:] != y.shape[1:]
        or x.dtype != y.dtype
        or (x.nbytes + y.nbytes) < small_fallback_bytes
        or x.shape[0] % _sublane_pack(x.dtype) != 0
    ):
        return jnp.concatenate([x, y], axis=0)

    mx, my = x.shape[0], y.shape[0]
    pack = _sublane_pack(x.dtype)

    # Static chunk plan (shapes are static at trace time).
    x_chunks = _split_rows(mx, num_cores * chunks_per_core, pack)
    y_chunks = _split_rows(my, num_cores * chunks_per_core, pack)
    x_per_core = [x_chunks[c::num_cores] for c in range(num_cores)]
    y_per_core = [y_chunks[c::num_cores] for c in range(num_cores)]
    max_sems = max(
        1, max(len(xc) + len(yc) for xc, yc in zip(x_per_core, y_per_core))
    )

    def kernel(x_hbm, y_hbm, o_hbm, sems):
        core = pl.program_id(0)
        for c in range(num_cores):
            if not x_per_core[c] and not y_per_core[c]:
                continue

            @pl.when(core == c)
            def _(c=c):
                copies = []
                s = 0
                for off, sz in x_per_core[c]:
                    copies.append(
                        pltpu.make_async_copy(
                            x_hbm.at[pl.ds(off, sz)],
                            o_hbm.at[pl.ds(off, sz)],
                            sems.at[s],
                        )
                    )
                    s += 1
                for off, sz in y_per_core[c]:
                    copies.append(
                        pltpu.make_async_copy(
                            y_hbm.at[pl.ds(off, sz)],
                            o_hbm.at[pl.ds(mx + off, sz)],
                            sems.at[s],
                        )
                    )
                    s += 1
                # Start every chunk before waiting any: all disjoint slabs
                # stay in flight concurrently.
                for cp in copies:
                    cp.start()
                for cp in copies:
                    cp.wait()

    out_shape = jax.ShapeDtypeStruct((mx + my,) + x.shape[1:], x.dtype)
    return pl.pallas_call(
        kernel,
        out_shape=out_shape,
        grid=(num_cores,),
        in_specs=[
            pl.BlockSpec(memory_space=pl.ANY),
            pl.BlockSpec(memory_space=pl.ANY),
        ],
        out_specs=pl.BlockSpec(memory_space=pl.ANY),
        scratch_shapes=[pltpu.SemaphoreType.DMA((max_sems,))],
        compiler_params=pltpu.CompilerParams(
            dimension_semantics=("parallel",)
        ),
        cost_estimate=pl.CostEstimate(
            flops=0,
            transcendentals=0,
            bytes_accessed=2 * (x.nbytes + y.nbytes),
        ),
    )(x, y)


def append_rows_inplace(buf: jax.Array, y: jax.Array, *, max_chunks: int = 8):
    """Append/grow variant (KV-cache pattern): `buf` already holds x in rows
    [0, buf.shape[0]-y.shape[0]); alias it to the output and DMA only y into
    the tail rows, saving the read+write of x entirely."""
    assert buf.ndim >= 2 and buf.shape[1:] == y.shape[1:]
    assert buf.dtype == y.dtype
    mx = buf.shape[0] - y.shape[0]
    pack = _sublane_pack(buf.dtype)
    assert mx >= 0 and mx % pack == 0, "seam must be sublane-tile aligned"

    y_chunks = _split_rows(y.shape[0], max_chunks, pack)
    n_sems = max(1, len(y_chunks))

    def kernel(buf_hbm, y_hbm, o_hbm, sems):
        del buf_hbm  # aliased to o_hbm; rows [0, mx) are already in place
        copies = []
        for s, (off, sz) in enumerate(y_chunks):
            copies.append(
                pltpu.make_async_copy(
                    y_hbm.at[pl.ds(off, sz)],
                    o_hbm.at[pl.ds(mx + off, sz)],
                    sems.at[s],
                )
            )
        for cp in copies:
            cp.start()
        for cp in copies:
            cp.wait()

    return pl.pallas_call(
        kernel,
        out_shape=jax.ShapeDtypeStruct(buf.shape, buf.dtype),
        in_specs=[
            pl.BlockSpec(memory_space=pl.ANY),
            pl.BlockSpec(memory_space=pl.ANY),
        ],
        out_specs=pl.BlockSpec(memory_space=pl.ANY),
        scratch_shapes=[pltpu.SemaphoreType.DMA((n_sems,))],
        input_output_aliases={0: 0},
        cost_estimate=pl.CostEstimate(
            flops=0, transcendentals=0, bytes_accessed=2 * y.nbytes
        ),
    )(buf, y)


if __name__ == "__main__":
    key = jax.random.PRNGKey(0)
    kx, ky = jax.random.split(key)
    # Lane-dense shapes (last dim multiple of 128); unequal, sublane-aligned
    # row counts exercise the seam offset and multi-chunk DMA plan.
    x = jax.random.normal(kx, (512, 256), dtype=jnp.float32)
    y = jax.random.normal(ky, (192, 256), dtype=jnp.float32)
    ref = jnp.concatenate([x, y], axis=0)

    # DMA-kernel path (disable the small-size gate so the demo exercises it;
    # production calls keep the default ~1 MiB threshold).
    out = concat_dim0(x, y, small_fallback_bytes=0)
    jax.block_until_ready(out)
    assert out.shape == (704, 256)
    assert jnp.array_equal(out, ref)

    # Unaligned-seam / small inputs take the jnp.concatenate fallback path.
    xs = jax.random.normal(kx, (100, 128), dtype=jnp.float32)  # 100 % 8 != 0
    ys = jax.random.normal(ky, (36, 128), dtype=jnp.float32)
    assert jnp.array_equal(
        concat_dim0(xs, ys), jnp.concatenate([xs, ys], axis=0)
    )

    # Aliased append variant: x already resident, only y is moved.
    buf = jnp.concatenate([x, jnp.zeros_like(y)], axis=0)
    appended = jax.jit(append_rows_inplace)(buf, y)
    jax.block_until_ready(appended)
    assert jnp.array_equal(appended, ref)

    print("KERNEL_OK")
</pallas_src>

<mosaic_0001>
module attributes {stable_mosaic.version = 11 : i64} {
  func.func @kernel(%arg0: i32, %arg1: memref<512x256xf32, #tpu.memory_space<any>>, %arg2: memref<192x256xf32, #tpu.memory_space<any>>, %arg3: memref<704x256xf32, #tpu.memory_space<any>>, %arg4: memref<8x!tpu.dma_semaphore, #tpu.memory_space<semaphore_mem>>) attributes {dimension_semantics = [#tpu.dimension_semantics<parallel>], iteration_bounds = array<i64: 2>, scalar_prefetch = 0 : i64, scratch_operands = 1 : i64, tpu.core_type = #tpu.core_type<tc>, window_params = [{}, {}, {}]} {
    %c0_i32 = arith.constant 0 : i32
    %0 = arith.cmpi eq, %arg0, %c0_i32 : i32
    %1 = arith.extui %0 : i1 to i32
    %c0_i32_0 = arith.constant 0 : i32
    %2 = arith.cmpi ne, %1, %c0_i32_0 : i32
    scf.if %2 {
      %c0_i32_2 = arith.constant 0 : i32
      %c0_i32_3 = arith.constant 0 : i32
      %c0_i32_4 = arith.constant 0 : i32
      %6 = tpu.memref_slice %arg1[%c0_i32_3, %c0_i32_4] : memref<512x256xf32, #tpu.memory_space<any>> -> memref<64x256xf32, #tpu.memory_space<any>>
      %c0_i32_5 = arith.constant 0 : i32
      %c0_i32_6 = arith.constant 0 : i32
      %7 = tpu.memref_slice %arg3[%c0_i32_5, %c0_i32_6] : memref<704x256xf32, #tpu.memory_space<any>> -> memref<64x256xf32, #tpu.memory_space<any>>
      %8 = tpu.memref_slice %arg4[%c0_i32_2] : memref<8x!tpu.dma_semaphore, #tpu.memory_space<semaphore_mem>> -> memref<1x!tpu.dma_semaphore, #tpu.memory_space<semaphore_mem>>
      %9 = tpu.memref_squeeze %8 : memref<1x!tpu.dma_semaphore, #tpu.memory_space<semaphore_mem>> -> memref<!tpu.dma_semaphore, #tpu.memory_space<semaphore_mem>>
      tpu.enqueue_dma source(%6 : memref<64x256xf32, #tpu.memory_space<any>>) target(%7 : memref<64x256xf32, #tpu.memory_space<any>>) target_semaphore(%9 : memref<!tpu.dma_semaphore, #tpu.memory_space<semaphore_mem>>)
      %c1_i32_7 = arith.constant 1 : i32
      %c128_i32 = arith.constant 128 : i32
      %c0_i32_8 = arith.constant 0 : i32
      %10 = tpu.memref_slice %arg1[%c128_i32, %c0_i32_8] : memref<512x256xf32, #tpu.memory_space<any>> -> memref<64x256xf32, #tpu.memory_space<any>>
      %c128_i32_9 = arith.constant 128 : i32
      %c0_i32_10 = arith.constant 0 : i32
      %11 = tpu.memref_slice %arg3[%c128_i32_9, %c0_i32_10] : memref<704x256xf32, #tpu.memory_space<any>> -> memref<64x256xf32, #tpu.memory_space<any>>
      %12 = tpu.memref_slice %arg4[%c1_i32_7] : memref<8x!tpu.dma_semaphore, #tpu.memory_space<semaphore_mem>> -> memref<1x!tpu.dma_semaphore, #tpu.memory_space<semaphore_mem>>
      %13 = tpu.memref_squeeze %12 : memref<1x!tpu.dma_semaphore, #tpu.memory_space<semaphore_mem>> -> memref<!tpu.dma_semaphore, #tpu.memory_space<semaphore_mem>>
      tpu.enqueue_dma source(%10 : memref<64x256xf32, #tpu.memory_space<any>>) target(%11 : memref<64x256xf32, #tpu.memory_space<any>>) target_semaphore(%13 : memref<!tpu.dma_semaphore, #tpu.memory_space<semaphore_mem>>)
      %c2_i32 = arith.constant 2 : i32
      %c256_i32 = arith.constant 256 : i32
      %c0_i32_11 = arith.constant 0 : i32
      %14 = tpu.memref_slice %arg1[%c256_i32, %c0_i32_11] : memref<512x256xf32, #tpu.memory_space<any>> -> memref<64x256xf32, #tpu.memory_space<any>>
      %c256_i32_12 = arith.constant 256 : i32
      %c0_i32_13 = arith.constant 0 : i32
      %15 = tpu.memref_slice %arg3[%c256_i32_12, %c0_i32_13] : memref<704x256xf32, #tpu.memory_space<any>> -> memref<64x256xf32, #tpu.memory_space<any>>
      %16 = tpu.memref_slice %arg4[%c2_i32] : memref<8x!tpu.dma_semaphore, #tpu.memory_space<semaphore_mem>> -> memref<1x!tpu.dma_semaphore, #tpu.memory_space<semaphore_mem>>
      %17 = tpu.memref_squeeze %16 : memref<1x!tpu.dma_semaphore, #tpu.memory_space<semaphore_mem>> -> memref<!tpu.dma_semaphore, #tpu.memory_space<semaphore_mem>>
      tpu.enqueue_dma source(%14 : memref<64x256xf32, #tpu.memory_space<any>>) target(%15 : memref<64x256xf32, #tpu.memory_space<any>>) target_semaphore(%17 : memref<!tpu.dma_semaphore, #tpu.memory_space<semaphore_mem>>)
      %c3_i32 = arith.constant 3 : i32
      %c384_i32 = arith.constant 384 : i32
      %c0_i32_14 = arith.constant 0 : i32
      %18 = tpu.memref_slice %arg1[%c384_i32, %c0_i32_14] : memref<512x256xf32, #tpu.memory_space<any>> -> memref<64x256xf32, #tpu.memory_space<any>>
      %c384_i32_15 = arith.constant 384 : i32
      %c0_i32_16 = arith.constant 0 : i32
      %19 = tpu.memref_slice %arg3[%c384_i32_15, %c0_i32_16] : memref<704x256xf32, #tpu.memory_space<any>> -> memref<64x256xf32, #tpu.memory_space<any>>
      %20 = tpu.memref_slice %arg4[%c3_i32] : memref<8x!tpu.dma_semaphore, #tpu.memory_space<semaphore_mem>> -> memref<1x!tpu.dma_semaphore, #tpu.memory_space<semaphore_mem>>
      %21 = tpu.memref_squeeze %20 : memref<1x!tpu.dma_semaphore, #tpu.memory_space<semaphore_mem>> -> memref<!tpu.dma_semaphore, #tpu.memory_space<semaphore_mem>>
      tpu.enqueue_dma source(%18 : memref<64x256xf32, #tpu.memory_space<any>>) target(%19 : memref<64x256xf32, #tpu.memory_space<any>>) target_semaphore(%21 : memref<!tpu.dma_semaphore, #tpu.memory_space<semaphore_mem>>)
      %c4_i32 = arith.constant 4 : i32
      %c0_i32_17 = arith.constant 0 : i32
      %c0_i32_18 = arith.constant 0 : i32
      %22 = tpu.memref_slice %arg2[%c0_i32_17, %c0_i32_18] : memref<192x256xf32, #tpu.memory_space<any>> -> memref<24x256xf32, #tpu.memory_space<any>>
      %c512_i32 = arith.constant 512 : i32
      %c0_i32_19 = arith.constant 0 : i32
      %23 = tpu.memref_slice %arg3[%c512_i32, %c0_i32_19] : memref<704x256xf32, #tpu.memory_space<any>> -> memref<24x256xf32, #tpu.memory_space<any>>
      %24 = tpu.memref_slice %arg4[%c4_i32] : memref<8x!tpu.dma_semaphore, #tpu.memory_space<semaphore_mem>> -> memref<1x!tpu.dma_semaphore, #tpu.memory_space<semaphore_mem>>
      %25 = tpu.memref_squeeze %24 : memref<1x!tpu.dma_semaphore, #tpu.memory_space<semaphore_mem>> -> memref<!tpu.dma_semaphore, #tpu.memory_space<semaphore_mem>>
      tpu.enqueue_dma source(%22 : memref<24x256xf32, #tpu.memory_space<any>>) target(%23 : memref<24x256xf32, #tpu.memory_space<any>>) target_semaphore(%25 : memref<!tpu.dma_semaphore, #tpu.memory_space<semaphore_mem>>)
      %c5_i32 = arith.constant 5 : i32
      %c48_i32 = arith.constant 48 : i32
      %c0_i32_20 = arith.constant 0 : i32
      %26 = tpu.memref_slice %arg2[%c48_i32, %c0_i32_20] : memref<192x256xf32, #tpu.memory_space<any>> -> memref<24x256xf32, #tpu.memory_space<any>>
      %c560_i32 = arith.constant 560 : i32
      %c0_i32_21 = arith.constant 0 : i32
      %27 = tpu.memref_slice %arg3[%c560_i32, %c0_i32_21] : memref<704x256xf32, #tpu.memory_space<any>> -> memref<24x256xf32, #tpu.memory_space<any>>
      %28 = tpu.memref_slice %arg4[%c5_i32] : memref<8x!tpu.dma_semaphore, #tpu.memory_space<semaphore_mem>> -> memref<1x!tpu.dma_semaphore, #tpu.memory_space<semaphore_mem>>
      %29 = tpu.memref_squeeze %28 : memref<1x!tpu.dma_semaphore, #tpu.memory_space<semaphore_mem>> -> memref<!tpu.dma_semaphore, #tpu.memory_space<semaphore_mem>>
      tpu.enqueue_dma source(%26 : memref<24x256xf32, #tpu.memory_space<any>>) target(%27 : memref<24x256xf32, #tpu.memory_space<any>>) target_semaphore(%29 : memref<!tpu.dma_semaphore, #tpu.memory_space<semaphore_mem>>)
      %c6_i32 = arith.constant 6 : i32
      %c96_i32 = arith.constant 96 : i32
      %c0_i32_22 = arith.constant 0 : i32
      %30 = tpu.memref_slice %arg2[%c96_i32, %c0_i32_22] : memref<192x256xf32, #tpu.memory_space<any>> -> memref<24x256xf32, #tpu.memory_space<any>>
      %c608_i32 = arith.constant 608 : i32
      %c0_i32_23 = arith.constant 0 : i32
      %31 = tpu.memref_slice %arg3[%c608_i32, %c0_i32_23] : memref<704x256xf32, #tpu.memory_space<any>> -> memref<24x256xf32, #tpu.memory_space<any>>
      %32 = tpu.memref_slice %arg4[%c6_i32] : memref<8x!tpu.dma_semaphore, #tpu.memory_space<semaphore_mem>> -> memref<1x!tpu.dma_semaphore, #tpu.memory_space<semaphore_mem>>
      %33 = tpu.memref_squeeze %32 : memref<1x!tpu.dma_semaphore, #tpu.memory_space<semaphore_mem>> -> memref<!tpu.dma_semaphore, #tpu.memory_space<semaphore_mem>>
      tpu.enqueue_dma source(%30 : memref<24x256xf32, #tpu.memory_space<any>>) target(%31 : memref<24x256xf32, #tpu.memory_space<any>>) target_semaphore(%33 : memref<!tpu.dma_semaphore, #tpu.memory_space<semaphore_mem>>)
      %c7_i32 = arith.constant 7 : i32
      %c144_i32 = arith.constant 144 : i32
      %c0_i32_24 = arith.constant 0 : i32
      %34 = tpu.memref_slice %arg2[%c144_i32, %c0_i32_24] : memref<192x256xf32, #tpu.memory_space<any>> -> memref<24x256xf32, #tpu.memory_space<any>>
      %c656_i32 = arith.constant 656 : i32
      %c0_i32_25 = arith.constant 0 : i32
      %35 = tpu.memref_slice %arg3[%c656_i32, %c0_i32_25] : memref<704x256xf32, #tpu.memory_space<any>> -> memref<24x256xf32, #tpu.memory_space<any>>
      %36 = tpu.memref_slice %arg4[%c7_i32] : memref<8x!tpu.dma_semaphore, #tpu.memory_space<semaphore_mem>> -> memref<1x!tpu.dma_semaphore, #tpu.memory_space<semaphore_mem>>
      %37 = tpu.memref_squeeze %36 : memref<1x!tpu.dma_semaphore, #tpu.memory_space<semaphore_mem>> -> memref<!tpu.dma_semaphore, #tpu.memory_space<semaphore_mem>>
      tpu.enqueue_dma source(%34 : memref<24x256xf32, #tpu.memory_space<any>>) target(%35 : memref<24x256xf32, #tpu.memory_space<any>>) target_semaphore(%37 : memref<!tpu.dma_semaphore, #tpu.memory_space<semaphore_mem>>)
      %c0_i32_26 = arith.constant 0 : i32
      %c0_i32_27 = arith.constant 0 : i32
      %c0_i32_28 = arith.constant 0 : i32
      %38 = tpu.memref_slice %arg1[%c0_i32_27, %c0_i32_28] : memref<512x256xf32, #tpu.memory_space<any>> -> memref<64x256xf32, #tpu.memory_space<any>>
      %c0_i32_29 = arith.constant 0 : i32
      %c0_i32_30 = arith.constant 0 : i32
      %39 = tpu.memref_slice %arg3[%c0_i32_29, %c0_i32_30] : memref<704x256xf32, #tpu.memory_space<any>> -> memref<64x256xf32, #tpu.memory_space<any>>
      %40 = tpu.memref_slice %arg4[%c0_i32_26] : memref<8x!tpu.dma_semaphore, #tpu.memory_space<semaphore_mem>> -> memref<1x!tpu.dma_semaphore, #tpu.memory_space<semaphore_mem>>
      %41 = tpu.memref_squeeze %40 : memref<1x!tpu.dma_semaphore, #tpu.memory_space<semaphore_mem>> -> memref<!tpu.dma_semaphore, #tpu.memory_space<semaphore_mem>>
      tpu.wait_dma2 semaphore(%41 : memref<!tpu.dma_semaphore, #tpu.memory_space<semaphore_mem>>) src(%38 : memref<64x256xf32, #tpu.memory_space<any>>) dst(%39 : memref<64x256xf32, #tpu.memory_space<any>>)
      %c1_i32_31 = arith.constant 1 : i32
      %c128_i32_32 = arith.constant 128 : i32
      %c0_i32_33 = arith.constant 0 : i32
      %42 = tpu.memref_slice %arg1[%c128_i32_32, %c0_i32_33] : memref<512x256xf32, #tpu.memory_space<any>> -> memref<64x256xf32, #tpu.memory_space<any>>
      %c128_i32_34 = arith.constant 128 : i32
      %c0_i32_35 = arith.constant 0 : i32
      %43 = tpu.memref_slice %arg3[%c128_i32_34, %c0_i32_35] : memref<704x256xf32, #tpu.memory_space<any>> -> memref<64x256xf32, #tpu.memory_space<any>>
      %44 = tpu.memref_slice %arg4[%c1_i32_31] : memref<8x!tpu.dma_semaphore, #tpu.memory_space<semaphore_mem>> -> memref<1x!tpu.dma_semaphore, #tpu.memory_space<semaphore_mem>>
      %45 = tpu.memref_squeeze %44 : memref<1x!tpu.dma_semaphore, #tpu.memory_space<semaphore_mem>> -> memref<!tpu.dma_semaphore, #tpu.memory_space<semaphore_mem>>
      tpu.wait_dma2 semaphore(%45 : memref<!tpu.dma_semaphore, #tpu.memory_space<semaphore_mem>>) src(%42 : memref<64x256xf32, #tpu.memory_space<any>>) dst(%43 : memref<64x256xf32, #tpu.memory_space<any>>)
      %c2_i32_36 = arith.constant 2 : i32
      %c256_i32_37 = arith.constant 256 : i32
      %c0_i32_38 = arith.constant 0 : i32
      %46 = tpu.memref_slice %arg1[%c256_i32_37, %c0_i32_38] : memref<512x256xf32, #tpu.memory_space<any>> -> memref<64x256xf32, #tpu.memory_space<any>>
      %c256_i32_39 = arith.constant 256 : i32
      %c0_i32_40 = arith.constant 0 : i32
      %47 = tpu.memref_slice %arg3[%c256_i32_39, %c0_i32_40] : memref<704x256xf32, #tpu.memory_space<any>> -> memref<64x256xf32, #tpu.memory_space<any>>
      %48 = tpu.memref_slice %arg4[%c2_i32_36] : memref<8x!tpu.dma_semaphore, #tpu.memory_space<semaphore_mem>> -> memref<1x!tpu.dma_semaphore, #tpu.memory_space<semaphore_mem>>
      %49 = tpu.memref_squeeze %48 : memref<1x!tpu.dma_semaphore, #tpu.memory_space<semaphore_mem>> -> memref<!tpu.dma_semaphore, #tpu.memory_space<semaphore_mem>>
      tpu.wait_dma2 semaphore(%49 : memref<!tpu.dma_semaphore, #tpu.memory_space<semaphore_mem>>) src(%46 : memref<64x256xf32, #tpu.memory_space<any>>) dst(%47 : memref<64x256xf32, #tpu.memory_space<any>>)
      %c3_i32_41 = arith.constant 3 : i32
      %c384_i32_42 = arith.constant 384 : i32
      %c0_i32_43 = arith.constant 0 : i32
      %50 = tpu.memref_slice %arg1[%c384_i32_42, %c0_i32_43] : memref<512x256xf32, #tpu.memory_space<any>> -> memref<64x256xf32, #tpu.memory_space<any>>
      %c384_i32_44 = arith.constant 384 : i32
      %c0_i32_45 = arith.constant 0 : i32
      %51 = tpu.memref_slice %arg3[%c384_i32_44, %c0_i32_45] : memref<704x256xf32, #tpu.memory_space<any>> -> memref<64x256xf32, #tpu.memory_space<any>>
      %52 = tpu.memref_slice %arg4[%c3_i32_41] : memref<8x!tpu.dma_semaphore, #tpu.memory_space<semaphore_mem>> -> memref<1x!tpu.dma_semaphore, #tpu.memory_space<semaphore_mem>>
      %53 = tpu.memref_squeeze %52 : memref<1x!tpu.dma_semaphore, #tpu.memory_space<semaphore_mem>> -> memref<!tpu.dma_semaphore, #tpu.memory_space<semaphore_mem>>
      tpu.wait_dma2 semaphore(%53 : memref<!tpu.dma_semaphore, #tpu.memory_space<semaphore_mem>>) src(%50 : memref<64x256xf32, #tpu.memory_space<any>>) dst(%51 : memref<64x256xf32, #tpu.memory_space<any>>)
      %c4_i32_46 = arith.constant 4 : i32
      %c0_i32_47 = arith.constant 0 : i32
      %c0_i32_48 = arith.constant 0 : i32
      %54 = tpu.memref_slice %arg2[%c0_i32_47, %c0_i32_48] : memref<192x256xf32, #tpu.memory_space<any>> -> memref<24x256xf32, #tpu.memory_space<any>>
      %c512_i32_49 = arith.constant 512 : i32
      %c0_i32_50 = arith.constant 0 : i32
      %55 = tpu.memref_slice %arg3[%c512_i32_49, %c0_i32_50] : memref<704x256xf32, #tpu.memory_space<any>> -> memref<24x256xf32, #tpu.memory_space<any>>
      %56 = tpu.memref_slice %arg4[%c4_i32_46] : memref<8x!tpu.dma_semaphore, #tpu.memory_space<semaphore_mem>> -> memref<1x!tpu.dma_semaphore, #tpu.memory_space<semaphore_mem>>
      %57 = tpu.memref_squeeze %56 : memref<1x!tpu.dma_semaphore, #tpu.memory_space<semaphore_mem>> -> memref<!tpu.dma_semaphore, #tpu.memory_space<semaphore_mem>>
      tpu.wait_dma2 semaphore(%57 : memref<!tpu.dma_semaphore, #tpu.memory_space<semaphore_mem>>) src(%54 : memref<24x256xf32, #tpu.memory_space<any>>) dst(%55 : memref<24x256xf32, #tpu.memory_space<any>>)
      %c5_i32_51 = arith.constant 5 : i32
      %c48_i32_52 = arith.constant 48 : i32
      %c0_i32_53 = arith.constant 0 : i32
      %58 = tpu.memref_slice %arg2[%c48_i32_52, %c0_i32_53] : memref<192x256xf32, #tpu.memory_space<any>> -> memref<24x256xf32, #tpu.memory_space<any>>
      %c560_i32_54 = arith.constant 560 : i32
      %c0_i32_55 = arith.constant 0 : i32
      %59 = tpu.memref_slice %arg3[%c560_i32_54, %c0_i32_55] : memref<704x256xf32, #tpu.memory_space<any>> -> memref<24x256xf32, #tpu.memory_space<any>>
      %60 = tpu.memref_slice %arg4[%c5_i32_51] : memref<8x!tpu.dma_semaphore, #tpu.memory_space<semaphore_mem>> -> memref<1x!tpu.dma_semaphore, #tpu.memory_space<semaphore_mem>>
      %61 = tpu.memref_squeeze %60 : memref<1x!tpu.dma_semaphore, #tpu.memory_space<semaphore_mem>> -> memref<!tpu.dma_semaphore, #tpu.memory_space<semaphore_mem>>
      tpu.wait_dma2 semaphore(%61 : memref<!tpu.dma_semaphore, #tpu.memory_space<semaphore_mem>>) src(%58 : memref<24x256xf32, #tpu.memory_space<any>>) dst(%59 : memref<24x256xf32, #tpu.memory_space<any>>)
      %c6_i32_56 = arith.constant 6 : i32
      %c96_i32_57 = arith.constant 96 : i32
      %c0_i32_58 = arith.constant 0 : i32
      %62 = tpu.memref_slice %arg2[%c96_i32_57, %c0_i32_58] : memref<192x256xf32, #tpu.memory_space<any>> -> memref<24x256xf32, #tpu.memory_space<any>>
      %c608_i32_59 = arith.constant 608 : i32
      %c0_i32_60 = arith.constant 0 : i32
      %63 = tpu.memref_slice %arg3[%c608_i32_59, %c0_i32_60] : memref<704x256xf32, #tpu.memory_space<any>> -> memref<24x256xf32, #tpu.memory_space<any>>
      %64 = tpu.memref_slice %arg4[%c6_i32_56] : memref<8x!tpu.dma_semaphore, #tpu.memory_space<semaphore_mem>> -> memref<1x!tpu.dma_semaphore, #tpu.memory_space<semaphore_mem>>
      %65 = tpu.memref_squeeze %64 : memref<1x!tpu.dma_semaphore, #tpu.memory_space<semaphore_mem>> -> memref<!tpu.dma_semaphore, #tpu.memory_space<semaphore_mem>>
      tpu.wait_dma2 semaphore(%65 : memref<!tpu.dma_semaphore, #tpu.memory_space<semaphore_mem>>) src(%62 : memref<24x256xf32, #tpu.memory_space<any>>) dst(%63 : memref<24x256xf32, #tpu.memory_space<any>>)
      %c7_i32_61 = arith.constant 7 : i32
      %c144_i32_62 = arith.constant 144 : i32
      %c0_i32_63 = arith.constant 0 : i32
      %66 = tpu.memref_slice %arg2[%c144_i32_62, %c0_i32_63] : memref<192x256xf32, #tpu.memory_space<any>> -> memref<24x256xf32, #tpu.memory_space<any>>
      %c656_i32_64 = arith.constant 656 : i32
      %c0_i32_65 = arith.constant 0 : i32
      %67 = tpu.memref_slice %arg3[%c656_i32_64, %c0_i32_65] : memref<704x256xf32, #tpu.memory_space<any>> -> memref<24x256xf32, #tpu.memory_space<any>>
      %68 = tpu.memref_slice %arg4[%c7_i32_61] : memref<8x!tpu.dma_semaphore, #tpu.memory_space<semaphore_mem>> -> memref<1x!tpu.dma_semaphore, #tpu.memory_space<semaphore_mem>>
      %69 = tpu.memref_squeeze %68 : memref<1x!tpu.dma_semaphore, #tpu.memory_space<semaphore_mem>> -> memref<!tpu.dma_semaphore, #tpu.memory_space<semaphore_mem>>
      tpu.wait_dma2 semaphore(%69 : memref<!tpu.dma_semaphore, #tpu.memory_space<semaphore_mem>>) src(%66 : memref<24x256xf32, #tpu.memory_space<any>>) dst(%67 : memref<24x256xf32, #tpu.memory_space<any>>)
    } else {
    }
    %c1_i32 = arith.constant 1 : i32
    %3 = arith.cmpi eq, %arg0, %c1_i32 : i32
    %4 = arith.extui %3 : i1 to i32
    %c0_i32_1 = arith.constant 0 : i32
    %5 = arith.cmpi ne, %4, %c0_i32_1 : i32
    scf.if %5 {
      %c0_i32_2 = arith.constant 0 : i32
      %c64_i32 = arith.constant 64 : i32
      %c0_i32_3 = arith.constant 0 : i32
      %6 = tpu.memref_slice %arg1[%c64_i32, %c0_i32_3] : memref<512x256xf32, #tpu.memory_space<any>> -> memref<64x256xf32, #tpu.memory_space<any>>
      %c64_i32_4 = arith.constant 64 : i32
      %c0_i32_5 = arith.constant 0 : i32
      %7 = tpu.memref_slice %arg3[%c64_i32_4, %c0_i32_5] : memref<704x256xf32, #tpu.memory_space<any>> -> memref<64x256xf32, #tpu.memory_space<any>>
      %8 = tpu.memref_slice %arg4[%c0_i32_2] : memref<8x!tpu.dma_semaphore, #tpu.memory_space<semaphore_mem>> -> memref<1x!tpu.dma_semaphore, #tpu.memory_space<semaphore_mem>>
      %9 = tpu.memref_squeeze %8 : memref<1x!tpu.dma_semaphore, #tpu.memory_space<semaphore_mem>> -> memref<!tpu.dma_semaphore, #tpu.memory_space<semaphore_mem>>
      tpu.enqueue_dma source(%6 : memref<64x256xf32, #tpu.memory_space<any>>) target(%7 : memref<64x256xf32, #tpu.memory_space<any>>) target_semaphore(%9 : memref<!tpu.dma_semaphore, #tpu.memory_space<semaphore_mem>>)
      %c1_i32_6 = arith.constant 1 : i32
      %c192_i32 = arith.constant 192 : i32
      %c0_i32_7 = arith.constant 0 : i32
      %10 = tpu.memref_slice %arg1[%c192_i32, %c0_i32_7] : memref<512x256xf32, #tpu.memory_space<any>> -> memref<64x256xf32, #tpu.memory_space<any>>
      %c192_i32_8 = arith.constant 192 : i32
      %c0_i32_9 = arith.constant 0 : i32
      %11 = tpu.memref_slice %arg3[%c192_i32_8, %c0_i32_9] : memref<704x256xf32, #tpu.memory_space<any>> -> memref<64x256xf32, #tpu.memory_space<any>>
      %12 = tpu.memref_slice %arg4[%c1_i32_6] : memref<8x!tpu.dma_semaphore, #tpu.memory_space<semaphore_mem>> -> memref<1x!tpu.dma_semaphore, #tpu.memory_space<semaphore_mem>>
      %13 = tpu.memref_squeeze %12 : memref<1x!tpu.dma_semaphore, #tpu.memory_space<semaphore_mem>> -> memref<!tpu.dma_semaphore, #tpu.memory_space<semaphore_mem>>
      tpu.enqueue_dma source(%10 : memref<64x256xf32, #tpu.memory_space<any>>) target(%11 : memref<64x256xf32, #tpu.memory_space<any>>) target_semaphore(%13 : memref<!tpu.dma_semaphore, #tpu.memory_space<semaphore_mem>>)
      %c2_i32 = arith.constant 2 : i32
      %c320_i32 = arith.constant 320 : i32
      %c0_i32_10 = arith.constant 0 : i32
      %14 = tpu.memref_slice %arg1[%c320_i32, %c0_i32_10] : memref<512x256xf32, #tpu.memory_space<any>> -> memref<64x256xf32, #tpu.memory_space<any>>
      %c320_i32_11 = arith.constant 320 : i32
      %c0_i32_12 = arith.constant 0 : i32
      %15 = tpu.memref_slice %arg3[%c320_i32_11, %c0_i32_12] : memref<704x256xf32, #tpu.memory_space<any>> -> memref<64x256xf32, #tpu.memory_space<any>>
      %16 = tpu.memref_slice %arg4[%c2_i32] : memref<8x!tpu.dma_semaphore, #tpu.memory_space<semaphore_mem>> -> memref<1x!tpu.dma_semaphore, #tpu.memory_space<semaphore_mem>>
      %17 = tpu.memref_squeeze %16 : memref<1x!tpu.dma_semaphore, #tpu.memory_space<semaphore_mem>> -> memref<!tpu.dma_semaphore, #tpu.memory_space<semaphore_mem>>
      tpu.enqueue_dma source(%14 : memref<64x256xf32, #tpu.memory_space<any>>) target(%15 : memref<64x256xf32, #tpu.memory_space<any>>) target_semaphore(%17 : memref<!tpu.dma_semaphore, #tpu.memory_space<semaphore_mem>>)
      %c3_i32 = arith.constant 3 : i32
      %c448_i32 = arith.constant 448 : i32
      %c0_i32_13 = arith.constant 0 : i32
      %18 = tpu.memref_slice %arg1[%c448_i32, %c0_i32_13] : memref<512x256xf32, #tpu.memory_space<any>> -> memref<64x256xf32, #tpu.memory_space<any>>
      %c448_i32_14 = arith.constant 448 : i32
      %c0_i32_15 = arith.constant 0 : i32
      %19 = tpu.memref_slice %arg3[%c448_i32_14, %c0_i32_15] : memref<704x256xf32, #tpu.memory_space<any>> -> memref<64x256xf32, #tpu.memory_space<any>>
      %20 = tpu.memref_slice %arg4[%c3_i32] : memref<8x!tpu.dma_semaphore, #tpu.memory_space<semaphore_mem>> -> memref<1x!tpu.dma_semaphore, #tpu.memory_space<semaphore_mem>>
      %21 = tpu.memref_squeeze %20 : memref<1x!tpu.dma_semaphore, #tpu.memory_space<semaphore_mem>> -> memref<!tpu.dma_semaphore, #tpu.memory_space<semaphore_mem>>
      tpu.enqueue_dma source(%18 : memref<64x256xf32, #tpu.memory_space<any>>) target(%19 : memref<64x256xf32, #tpu.memory_space<any>>) target_semaphore(%21 : memref<!tpu.dma_semaphore, #tpu.memory_space<semaphore_mem>>)
      %c4_i32 = arith.constant 4 : i32
      %c24_i32 = arith.constant 24 : i32
      %c0_i32_16 = arith.constant 0 : i32
      %22 = tpu.memref_slice %arg2[%c24_i32, %c0_i32_16] : memref<192x256xf32, #tpu.memory_space<any>> -> memref<24x256xf32, #tpu.memory_space<any>>
      %c536_i32 = arith.constant 536 : i32
      %c0_i32_17 = arith.constant 0 : i32
      %23 = tpu.memref_slice %arg3[%c536_i32, %c0_i32_17] : memref<704x256xf32, #tpu.memory_space<any>> -> memref<24x256xf32, #tpu.memory_space<any>>
      %24 = tpu.memref_slice %arg4[%c4_i32] : memref<8x!tpu.dma_semaphore, #tpu.memory_space<semaphore_mem>> -> memref<1x!tpu.dma_semaphore, #tpu.memory_space<semaphore_mem>>
      %25 = tpu.memref_squeeze %24 : memref<1x!tpu.dma_semaphore, #tpu.memory_space<semaphore_mem>> -> memref<!tpu.dma_semaphore, #tpu.memory_space<semaphore_mem>>
      tpu.enqueue_dma source(%22 : memref<24x256xf32, #tpu.memory_space<any>>) target(%23 : memref<24x256xf32, #tpu.memory_space<any>>) target_semaphore(%25 : memref<!tpu.dma_semaphore, #tpu.memory_space<semaphore_mem>>)
      %c5_i32 = arith.constant 5 : i32
      %c72_i32 = arith.constant 72 : i32
      %c0_i32_18 = arith.constant 0 : i32
      %26 = tpu.memref_slice %arg2[%c72_i32, %c0_i32_18] : memref<192x256xf32, #tpu.memory_space<any>> -> memref<24x256xf32, #tpu.memory_space<any>>
      %c584_i32 = arith.constant 584 : i32
      %c0_i32_19 = arith.constant 0 : i32
      %27 = tpu.memref_slice %arg3[%c584_i32, %c0_i32_19] : memref<704x256xf32, #tpu.memory_space<any>> -> memref<24x256xf32, #tpu.memory_space<any>>
      %28 = tpu.memref_slice %arg4[%c5_i32] : memref<8x!tpu.dma_semaphore, #tpu.memory_space<semaphore_mem>> -> memref<1x!tpu.dma_semaphore, #tpu.memory_space<semaphore_mem>>
      %29 = tpu.memref_squeeze %28 : memref<1x!tpu.dma_semaphore, #tpu.memory_space<semaphore_mem>> -> memref<!tpu.dma_semaphore, #tpu.memory_space<semaphore_mem>>
      tpu.enqueue_dma source(%26 : memref<24x256xf32, #tpu.memory_space<any>>) target(%27 : memref<24x256xf32, #tpu.memory_space<any>>) target_semaphore(%29 : memref<!tpu.dma_semaphore, #tpu.memory_space<semaphore_mem>>)
      %c6_i32 = arith.constant 6 : i32
      %c120_i32 = arith.constant 120 : i32
      %c0_i32_20 = arith.constant 0 : i32
      %30 = tpu.memref_slice %arg2[%c120_i32, %c0_i32_20] : memref<192x256xf32, #tpu.memory_space<any>> -> memref<24x256xf32, #tpu.memory_space<any>>
      %c632_i32 = arith.constant 632 : i32
      %c0_i32_21 = arith.constant 0 : i32
      %31 = tpu.memref_slice %arg3[%c632_i32, %c0_i32_21] : memref<704x256xf32, #tpu.memory_space<any>> -> memref<24x256xf32, #tpu.memory_space<any>>
      %32 = tpu.memref_slice %arg4[%c6_i32] : memref<8x!tpu.dma_semaphore, #tpu.memory_space<semaphore_mem>> -> memref<1x!tpu.dma_semaphore, #tpu.memory_space<semaphore_mem>>
      %33 = tpu.memref_squeeze %32 : memref<1x!tpu.dma_semaphore, #tpu.memory_space<semaphore_mem>> -> memref<!tpu.dma_semaphore, #tpu.memory_space<semaphore_mem>>
      tpu.enqueue_dma source(%30 : memref<24x256xf32, #tpu.memory_space<any>>) target(%31 : memref<24x256xf32, #tpu.memory_space<any>>) target_semaphore(%33 : memref<!tpu.dma_semaphore, #tpu.memory_space<semaphore_mem>>)
      %c7_i32 = arith.constant 7 : i32
      %c168_i32 = arith.constant 168 : i32
      %c0_i32_22 = arith.constant 0 : i32
      %34 = tpu.memref_slice %arg2[%c168_i32, %c0_i32_22] : memref<192x256xf32, #tpu.memory_space<any>> -> memref<24x256xf32, #tpu.memory_space<any>>
      %c680_i32 = arith.constant 680 : i32
      %c0_i32_23 = arith.constant 0 : i32
      %35 = tpu.memref_slice %arg3[%c680_i32, %c0_i32_23] : memref<704x256xf32, #tpu.memory_space<any>> -> memref<24x256xf32, #tpu.memory_space<any>>
      %36 = tpu.memref_slice %arg4[%c7_i32] : memref<8x!tpu.dma_semaphore, #tpu.memory_space<semaphore_mem>> -> memref<1x!tpu.dma_semaphore, #tpu.memory_space<semaphore_mem>>
      %37 = tpu.memref_squeeze %36 : memref<1x!tpu.dma_semaphore, #tpu.memory_space<semaphore_mem>> -> memref<!tpu.dma_semaphore, #tpu.memory_space<semaphore_mem>>
      tpu.enqueue_dma source(%34 : memref<24x256xf32, #tpu.memory_space<any>>) target(%35 : memref<24x256xf32, #tpu.memory_space<any>>) target_semaphore(%37 : memref<!tpu.dma_semaphore, #tpu.memory_space<semaphore_mem>>)
      %c0_i32_24 = arith.constant 0 : i32
      %c64_i32_25 = arith.constant 64 : i32
      %c0_i32_26 = arith.constant 0 : i32
      %38 = tpu.memref_slice %arg1[%c64_i32_25, %c0_i32_26] : memref<512x256xf32, #tpu.memory_space<any>> -> memref<64x256xf32, #tpu.memory_space<any>>
      %c64_i32_27 = arith.constant 64 : i32
      %c0_i32_28 = arith.constant 0 : i32
      %39 = tpu.memref_slice %arg3[%c64_i32_27, %c0_i32_28] : memref<704x256xf32, #tpu.memory_space<any>> -> memref<64x256xf32, #tpu.memory_space<any>>
      %40 = tpu.memref_slice %arg4[%c0_i32_24] : memref<8x!tpu.dma_semaphore, #tpu.memory_space<semaphore_mem>> -> memref<1x!tpu.dma_semaphore, #tpu.memory_space<semaphore_mem>>
      %41 = tpu.memref_squeeze %40 : memref<1x!tpu.dma_semaphore, #tpu.memory_space<semaphore_mem>> -> memref<!tpu.dma_semaphore, #tpu.memory_space<semaphore_mem>>
      tpu.wait_dma2 semaphore(%41 : memref<!tpu.dma_semaphore, #tpu.memory_space<semaphore_mem>>) src(%38 : memref<64x256xf32, #tpu.memory_space<any>>) dst(%39 : memref<64x256xf32, #tpu.memory_space<any>>)
      %c1_i32_29 = arith.constant 1 : i32
      %c192_i32_30 = arith.constant 192 : i32
      %c0_i32_31 = arith.constant 0 : i32
      %42 = tpu.memref_slice %arg1[%c192_i32_30, %c0_i32_31] : memref<512x256xf32, #tpu.memory_space<any>> -> memref<64x256xf32, #tpu.memory_space<any>>
      %c192_i32_32 = arith.constant 192 : i32
      %c0_i32_33 = arith.constant 0 : i32
      %43 = tpu.memref_slice %arg3[%c192_i32_32, %c0_i32_33] : memref<704x256xf32, #tpu.memory_space<any>> -> memref<64x256xf32, #tpu.memory_space<any>>
      %44 = tpu.memref_slice %arg4[%c1_i32_29] : memref<8x!tpu.dma_semaphore, #tpu.memory_space<semaphore_mem>> -> memref<1x!tpu.dma_semaphore, #tpu.memory_space<semaphore_mem>>
      %45 = tpu.memref_squeeze %44 : memref<1x!tpu.dma_semaphore, #tpu.memory_space<semaphore_mem>> -> memref<!tpu.dma_semaphore, #tpu.memory_space<semaphore_mem>>
      tpu.wait_dma2 semaphore(%45 : memref<!tpu.dma_semaphore, #tpu.memory_space<semaphore_mem>>) src(%42 : memref<64x256xf32, #tpu.memory_space<any>>) dst(%43 : memref<64x256xf32, #tpu.memory_space<any>>)
      %c2_i32_34 = arith.constant 2 : i32
      %c320_i32_35 = arith.constant 320 : i32
      %c0_i32_36 = arith.constant 0 : i32
      %46 = tpu.memref_slice %arg1[%c320_i32_35, %c0_i32_36] : memref<512x256xf32, #tpu.memory_space<any>> -> memref<64x256xf32, #tpu.memory_space<any>>
      %c320_i32_37 = arith.constant 320 : i32
      %c0_i32_38 = arith.constant 0 : i32
      %47 = tpu.memref_slice %arg3[%c320_i32_37, %c0_i32_38] : memref<704x256xf32, #tpu.memory_space<any>> -> memref<64x256xf32, #tpu.memory_space<any>>
      %48 = tpu.memref_slice %arg4[%c2_i32_34] : memref<8x!tpu.dma_semaphore, #tpu.memory_space<semaphore_mem>> -> memref<1x!tpu.dma_semaphore, #tpu.memory_space<semaphore_mem>>
      %49 = tpu.memref_squeeze %48 : memref<1x!tpu.dma_semaphore, #tpu.memory_space<semaphore_mem>> -> memref<!tpu.dma_semaphore, #tpu.memory_space<semaphore_mem>>
      tpu.wait_dma2 semaphore(%49 : memref<!tpu.dma_semaphore, #tpu.memory_space<semaphore_mem>>) src(%46 : memref<64x256xf32, #tpu.memory_space<any>>) dst(%47 : memref<64x256xf32, #tpu.memory_space<any>>)
      %c3_i32_39 = arith.constant 3 : i32
      %c448_i32_40 = arith.constant 448 : i32
      %c0_i32_41 = arith.constant 0 : i32
      %50 = tpu.memref_slice %arg1[%c448_i32_40, %c0_i32_41] : memref<512x256xf32, #tpu.memory_space<any>> -> memref<64x256xf32, #tpu.memory_space<any>>
      %c448_i32_42 = arith.constant 448 : i32
      %c0_i32_43 = arith.constant 0 : i32
      %51 = tpu.memref_slice %arg3[%c448_i32_42, %c0_i32_43] : memref<704x256xf32, #tpu.memory_space<any>> -> memref<64x256xf32, #tpu.memory_space<any>>
      %52 = tpu.memref_slice %arg4[%c3_i32_39] : memref<8x!tpu.dma_semaphore, #tpu.memory_space<semaphore_mem>> -> memref<1x!tpu.dma_semaphore, #tpu.memory_space<semaphore_mem>>
      %53 = tpu.memref_squeeze %52 : memref<1x!tpu.dma_semaphore, #tpu.memory_space<semaphore_mem>> -> memref<!tpu.dma_semaphore, #tpu.memory_space<semaphore_mem>>
      tpu.wait_dma2 semaphore(%53 : memref<!tpu.dma_semaphore, #tpu.memory_space<semaphore_mem>>) src(%50 : memref<64x256xf32, #tpu.memory_space<any>>) dst(%51 : memref<64x256xf32, #tpu.memory_space<any>>)
      %c4_i32_44 = arith.constant 4 : i32
      %c24_i32_45 = arith.constant 24 : i32
      %c0_i32_46 = arith.constant 0 : i32
      %54 = tpu.memref_slice %arg2[%c24_i32_45, %c0_i32_46] : memref<192x256xf32, #tpu.memory_space<any>> -> memref<24x256xf32, #tpu.memory_space<any>>
      %c536_i32_47 = arith.constant 536 : i32
      %c0_i32_48 = arith.constant 0 : i32
      %55 = tpu.memref_slice %arg3[%c536_i32_47, %c0_i32_48] : memref<704x256xf32, #tpu.memory_space<any>> -> memref<24x256xf32, #tpu.memory_space<any>>
      %56 = tpu.memref_slice %arg4[%c4_i32_44] : memref<8x!tpu.dma_semaphore, #tpu.memory_space<semaphore_mem>> -> memref<1x!tpu.dma_semaphore, #tpu.memory_space<semaphore_mem>>
      %57 = tpu.memref_squeeze %56 : memref<1x!tpu.dma_semaphore, #tpu.memory_space<semaphore_mem>> -> memref<!tpu.dma_semaphore, #tpu.memory_space<semaphore_mem>>
      tpu.wait_dma2 semaphore(%57 : memref<!tpu.dma_semaphore, #tpu.memory_space<semaphore_mem>>) src(%54 : memref<24x256xf32, #tpu.memory_space<any>>) dst(%55 : memref<24x256xf32, #tpu.memory_space<any>>)
      %c5_i32_49 = arith.constant 5 : i32
      %c72_i32_50 = arith.constant 72 : i32
      %c0_i32_51 = arith.constant 0 : i32
      %58 = tpu.memref_slice %arg2[%c72_i32_50, %c0_i32_51] : memref<192x256xf32, #tpu.memory_space<any>> -> memref<24x256xf32, #tpu.memory_space<any>>
      %c584_i32_52 = arith.constant 584 : i32
      %c0_i32_53 = arith.constant 0 : i32
      %59 = tpu.memref_slice %arg3[%c584_i32_52, %c0_i32_53] : memref<704x256xf32, #tpu.memory_space<any>> -> memref<24x256xf32, #tpu.memory_space<any>>
      %60 = tpu.memref_slice %arg4[%c5_i32_49] : memref<8x!tpu.dma_semaphore, #tpu.memory_space<semaphore_mem>> -> memref<1x!tpu.dma_semaphore, #tpu.memory_space<semaphore_mem>>
      %61 = tpu.memref_squeeze %60 : memref<1x!tpu.dma_semaphore, #tpu.memory_space<semaphore_mem>> -> memref<!tpu.dma_semaphore, #tpu.memory_space<semaphore_mem>>
      tpu.wait_dma2 semaphore(%61 : memref<!tpu.dma_semaphore, #tpu.memory_space<semaphore_mem>>) src(%58 : memref<24x256xf32, #tpu.memory_space<any>>) dst(%59 : memref<24x256xf32, #tpu.memory_space<any>>)
      %c6_i32_54 = arith.constant 6 : i32
      %c120_i32_55 = arith.constant 120 : i32
      %c0_i32_56 = arith.constant 0 : i32
      %62 = tpu.memref_slice %arg2[%c120_i32_55, %c0_i32_56] : memref<192x256xf32, #tpu.memory_space<any>> -> memref<24x256xf32, #tpu.memory_space<any>>
      %c632_i32_57 = arith.constant 632 : i32
      %c0_i32_58 = arith.constant 0 : i32
      %63 = tpu.memref_slice %arg3[%c632_i32_57, %c0_i32_58] : memref<704x256xf32, #tpu.memory_space<any>> -> memref<24x256xf32, #tpu.memory_space<any>>
      %64 = tpu.memref_slice %arg4[%c6_i32_54] : memref<8x!tpu.dma_semaphore, #tpu.memory_space<semaphore_mem>> -> memref<1x!tpu.dma_semaphore, #tpu.memory_space<semaphore_mem>>
      %65 = tpu.memref_squeeze %64 : memref<1x!tpu.dma_semaphore, #tpu.memory_space<semaphore_mem>> -> memref<!tpu.dma_semaphore, #tpu.memory_space<semaphore_mem>>
      tpu.wait_dma2 semaphore(%65 : memref<!tpu.dma_semaphore, #tpu.memory_space<semaphore_mem>>) src(%62 : memref<24x256xf32, #tpu.memory_space<any>>) dst(%63 : memref<24x256xf32, #tpu.memory_space<any>>)
      %c7_i32_59 = arith.constant 7 : i32
      %c168_i32_60 = arith.constant 168 : i32
      %c0_i32_61 = arith.constant 0 : i32
      %66 = tpu.memref_slice %arg2[%c168_i32_60, %c0_i32_61] : memref<192x256xf32, #tpu.memory_space<any>> -> memref<24x256xf32, #tpu.memory_space<any>>
      %c680_i32_62 = arith.constant 680 : i32
      %c0_i32_63 = arith.constant 0 : i32
      %67 = tpu.memref_slice %arg3[%c680_i32_62, %c0_i32_63] : memref<704x256xf32, #tpu.memory_space<any>> -> memref<24x256xf32, #tpu.memory_space<any>>
      %68 = tpu.memref_slice %arg4[%c7_i32_59] : memref<8x!tpu.dma_semaphore, #tpu.memory_space<semaphore_mem>> -> memref<1x!tpu.dma_semaphore, #tpu.memory_space<semaphore_mem>>
      %69 = tpu.memref_squeeze %68 : memref<1x!tpu.dma_semaphore, #tpu.memory_space<semaphore_mem>> -> memref<!tpu.dma_semaphore, #tpu.memory_space<semaphore_mem>>
      tpu.wait_dma2 semaphore(%69 : memref<!tpu.dma_semaphore, #tpu.memory_space<semaphore_mem>>) src(%66 : memref<24x256xf32, #tpu.memory_space<any>>) dst(%67 : memref<24x256xf32, #tpu.memory_space<any>>)
    } else {
    }
    return
  }
}

</mosaic_0001>

<bundles_post_ra>
// kernel: tpu_custom_call.1
= control target key start
LH: loop header
LB: loop body
LE: loop exit
PB: predicated region body
PF: predicated region fallthrough
CT: control target
= control target key end

     0   :  { %s564_s9 = smov 0   ;;  %s798_s0 = inlined_call_operand.hbm [shape: f32[512,256], index: 0, kind: input, shape index: {}]   ;;  %s799_s1 = inlined_call_operand.hbm [shape: f32[192,256], index: 1, kind: input, shape index: {}]   ;;  %s800_s2 = inlined_call_operand.hbm [shape: f32[704,256], index: 2, kind: output, shape index: {}]  }
   0x1 LB: > { %p417_p0 = scmp.eq.s32.totalorder %s522_s9, 0  ;;  %s31_s12 = scalar_lea.hbm %s798_s0, 4096  ;;  %s522_s9 = sphi %s564_s9, %s12_s9  }
   0x2   : > { %s524_s13 = smov [#allocation2]   ;;  %s525_s14 = smov [#allocation3]  }
   0x3   : > { %s526_s15 = smov 0   ;;  %s32_s22 = scalar_lea.hbm %s800_s2, 4096 }
   0x4   : > { %384 = dma.general (%p417_p0), %s798_s0, 2048, %s800_s2, %s524_s13, %s525_s14, [#allocation4], %s526_s15, 0  }
   0x5   : > { %s47_s25 = scalar_lea.hbm %s798_s0, 8192  ;;  %s527_s26 = smov [#allocation2 + $0x1]  }
   0x6   : > { %s528_s27 = smov [#allocation5]   ;;  %s48_s30 = scalar_lea.hbm %s800_s2, 8192 }
   0x7   : > { %385 = dma.general (%p417_p0), %s31_s12, 2048, %s32_s22, %s527_s26, %s528_s27, [#allocation6], %s526_s15, 0  }
   0x8   : > { %s63_s5 = scalar_lea.hbm %s798_s0, 12288  ;;  %s529_s6 = smov [#allocation2 + $0x2]  }
   0x9   : > { %s530_s7 = smov [#allocation7]   ;;  %s64_s11 = scalar_lea.hbm %s800_s2, 12288 }
   0xa   : > { %386 = dma.general (%p417_p0), %s47_s25, 2048, %s48_s30, %s529_s6, %s530_s7, [#allocation8], %s526_s15, 0  }
   0xb   : > { %s79_s16 = scalar_lea.hbm %s800_s2, 16384  ;;  %s531_s17 = smov [#allocation2 + $0x3]  }
   0xc   : > { %s532_s18 = smov [#allocation9]   ;;  %s533_s19 = smov [#allocation2 + $0x4]  }
   0xd   : > { %387 = dma.general (%p417_p0), %s63_s5, 2048, %s64_s11, %s531_s17, %s532_s18, [#allocation10], %s526_s15, 0  }
   0xe   : > { %s534_s20 = smov [#allocation11]   ;;  %s94_s25 = scalar_lea.hbm %s799_s1, 1536 }
   0xf   : > { %388 = dma.general (%p417_p0), %s799_s1, 768, %s79_s16, %s533_s19, %s534_s20, [#allocation12], %s526_s15, 0  }
  0x10   : > { %s95_s29 = scalar_lea.hbm %s800_s2, 17920  ;;  %s535_s30 = smov [#allocation2 + $0x5]  }
  0x11   : > { %s536_s3 = smov [#allocation13]   ;;  %s110_s7 = scalar_lea.hbm %s799_s1, 3072 }
  0x12   : > { %389 = dma.general (%p417_p0), %s94_s25, 768, %s95_s29, %s535_s30, %s536_s3, [#allocation14], %s526_s15, 0  }
  0x13   : > { %s111_s11 = scalar_lea.hbm %s800_s2, 19456  ;;  %s537_s12 = smov [#allocation2 + $0x6]  }
  0x14   : > { %s538_s14 = smov [#allocation15]   ;;  %s126_s20 = scalar_lea.hbm %s799_s1, 4608 }
  0x15   : > { %390 = dma.general (%p417_p0), %s110_s7, 768, %s111_s11, %s537_s12, %s538_s14, [#allocation16], %s526_s15, 0  }
  0x16   : > { %s127_s23 = scalar_lea.hbm %s800_s2, 20992  ;;  %s539_s24 = smov [#allocation2 + $0x7]  }
  0x17   : > { %s540_s25 = smov [#allocation17]  }
  0x18   : > { %391 = dma.general (%p417_p0), %s126_s20, 768, %s127_s23, %s539_s24, %s540_s25, [#allocation18], %s526_s15, 0  }
  0x19   : > { %457 = dma.done.wait (%p417_p0), [#allocation2], 2048 }
  0x1a   : > { %459 = vsyncadd (%p417_p0), [#allocation2], 4294965248 }
  0x1b   : > { %461 = dma.done.wait (%p417_p0), [#allocation2 + $0x1], 2048 }
  0x1c   : > { %463 = vsyncadd (%p417_p0), [#allocation2 + $0x1], 4294965248 }
  0x1d   : > { %465 = dma.done.wait (%p417_p0), [#allocation2 + $0x2], 2048 }
  0x1e   : > { %467 = vsyncadd (%p417_p0), [#allocation2 + $0x2], 4294965248 }
  0x1f   : > { %469 = dma.done.wait (%p417_p0), [#allocation2 + $0x3], 2048 }
  0x20   : > { %471 = vsyncadd (%p417_p0), [#allocation2 + $0x3], 4294965248 }
  0x21   : > { %473 = dma.done.wait (%p417_p0), [#allocation2 + $0x4], 768 }
  0x22   : > { %475 = vsyncadd (%p417_p0), [#allocation2 + $0x4], 4294966528 }
  0x23   : > { %477 = dma.done.wait (%p417_p0), [#allocation2 + $0x5], 768 }
  0x24   : > { %479 = vsyncadd (%p417_p0), [#allocation2 + $0x5], 4294966528 }
  0x25   : > { %481 = dma.done.wait (%p417_p0), [#allocation2 + $0x6], 768 }
  0x26   : > { %483 = vsyncadd (%p417_p0), [#allocation2 + $0x6], 4294966528 }
  0x27   : > { %485 = dma.done.wait (%p417_p0), [#allocation2 + $0x7], 768 }
  0x28   : > { %487 = vsyncadd (%p417_p0), [#allocation2 + $0x7], 4294966528  ;;  %p418_p1 = scmp.eq.s32.totalorder %s522_s9, 1  ;;  %s166_s29 = scalar_lea.hbm %s798_s0, 2048 }
  0x29   : > { %s167_s5 = scalar_lea.hbm %s800_s2, 2048  ;;  %s181_s10 = scalar_lea.hbm %s798_s0, 6144 }
  0x2a   : > { %s541_s11 = smov [#allocation19]   ;;  %s182_s18 = scalar_lea.hbm %s800_s2, 6144 }
  0x2b   : > { %401 = dma.general (%p418_p1), %s166_s29, 2048, %s167_s5, %s524_s13, %s541_s11, [#allocation20], %s526_s15, 0  }
  0x2c   : > { %s542_s20 = smov [#allocation21]   ;;  %s197_s23 = scalar_lea.hbm %s798_s0, 10240 }
  0x2d   : > { %402 = dma.general (%p418_p1), %s181_s10, 2048, %s182_s18, %s527_s26, %s542_s20, [#allocation22], %s526_s15, 0  }
  0x2e   : > { %s198_s28 = scalar_lea.hbm %s800_s2, 10240  ;;  %s213_s3 = scalar_lea.hbm %s798_s0, 14336 }
  0x2f   : > { %s543_s4 = smov [#allocation23]   ;;  %s214_s7 = scalar_lea.hbm %s800_s2, 14336 }
  0x30   : > { %403 = dma.general (%p418_p1), %s197_s23, 2048, %s198_s28, %s529_s6, %s543_s4, [#allocation24], %s526_s15, 0  }
  0x31   : > { %s544_s8 = smov [#allocation25]   ;;  %s229_s14 = scalar_lea.hbm %s799_s1, 768 }
  0x32   : > { %404 = dma.general (%p418_p1), %s213_s3, 2048, %s214_s7, %s531_s17, %s544_s8, [#allocation26], %s526_s15, 0  }
  0x33   : > { %s230_s6 = scalar_lea.hbm %s800_s2, 17152  ;;  %s245_s22 = scalar_lea.hbm %s799_s1, 2304 }
  0x34   : > { %s545_s23 = smov [#allocation27]   ;;  %s246_s27 = scalar_lea.hbm %s800_s2, 18688 }
  0x35   : > { %405 = dma.general (%p418_p1), %s229_s14, 768, %s230_s6, %s533_s19, %s545_s23, [#allocation28], %s526_s15, 0  }
  0x36   : > { %s546_s28 = smov [#allocation29]   ;;  %s261_s3 = scalar_lea.hbm %s799_s1, 3840 }
  0x37   : > { %406 = dma.general (%p418_p1), %s245_s22, 768, %s246_s27, %s535_s30, %s546_s28, [#allocation30], %s526_s15, 0  }
  0x38   : > { %s262_s26 = scalar_lea.hbm %s800_s2, 20224  ;;  %s277_s19 = scalar_lea.hbm %s799_s1, 5376 }
  0x39   : > { %s547_s10 = smov [#allocation31]   ;;  %s278_s30 = scalar_lea.hbm %s800_s2, 21760 }
  0x3a   : > { %407 = dma.general (%p418_p1), %s261_s3, 768, %s262_s26, %s537_s12, %s547_s10, [#allocation32], %s526_s15, 0  }
  0x3b   : > { %s548_s16 = smov [#allocation33]  }
  0x3c   : > { %408 = dma.general (%p418_p1), %s277_s19, 768, %s278_s30, %s539_s24, %s548_s16, [#allocation34], %s526_s15, 0  }
  0x3d   : > { %489 = dma.done.wait (%p418_p1), [#allocation2], 2048 }
  0x3e   : > { %491 = vsyncadd (%p418_p1), [#allocation2], 4294965248 }
  0x3f   : > { %493 = dma.done.wait (%p418_p1), [#allocation2 + $0x1], 2048 }
  0x40   : > { %495 = vsyncadd (%p418_p1), [#allocation2 + $0x1], 4294965248 }
  0x41   : > { %497 = dma.done.wait (%p418_p1), [#allocation2 + $0x2], 2048 }
  0x42   : > { %499 = vsyncadd (%p418_p1), [#allocation2 + $0x2], 4294965248 }
  0x43   : > { %501 = dma.done.wait (%p418_p1), [#allocation2 + $0x3], 2048 }
  0x44   : > { %503 = vsyncadd (%p418_p1), [#allocation2 + $0x3], 4294965248 }
  0x45   : > { %505 = dma.done.wait (%p418_p1), [#allocation2 + $0x4], 768 }
  0x46   : > { %507 = vsyncadd (%p418_p1), [#allocation2 + $0x4], 4294966528 }
  0x47   : > { %509 = dma.done.wait (%p418_p1), [#allocation2 + $0x5], 768 }
  0x48   : > { %511 = vsyncadd (%p418_p1), [#allocation2 + $0x5], 4294966528 }
  0x49   : > { %513 = dma.done.wait (%p418_p1), [#allocation2 + $0x6], 768 }
  0x4a   : > { %515 = vsyncadd (%p418_p1), [#allocation2 + $0x6], 4294966528 }
  0x4b   : > { %517 = dma.done.wait (%p418_p1), [#allocation2 + $0x7], 768 }
  0x4c   : > { %519 = vsyncadd (%p418_p1), [#allocation2 + $0x7], 4294966528  ;;  %s12_s9 = sadd.s32 1, %s522_s9  }
  0x4d   : > { %p9_p2 = scmp.ge.s32.totalorder %s12_s9, 2  }
  0x4f   :  { %11 = sbr.rel (!%p9_p2) target bundleno = 1 (0x1), region = 77 }
  0x56   :  { %313 = vsyncmov [#allocation2] }
  0x59   :  { %s314_s15 = vpop.sfrf %313 }
  0x5a   :  { %p375_p3 = scmp.ne.s32.totalorder %s314_s15, 0 }
  0x5c   :  { %318 = shalt.err (%p375_p3)  }
  0x5d   :  { %320 = vsyncmov [#allocation2 + $0x1] }
  0x60   :  { %s321_s12 = vpop.sfrf %320 }
  0x61   :  { %p376_p4 = scmp.ne.s32.totalorder %s321_s12, 0 }
  0x63   :  { %325 = shalt.err (%p376_p4)  }
  0x64   :  { %327 = vsyncmov [#allocation2 + $0x2] }
  0x67   :  { %s328_s24 = vpop.sfrf %327 }
  0x68   :  { %p377_p5 = scmp.ne.s32.totalorder %s328_s24, 0 }
  0x6a   :  { %332 = shalt.err (%p377_p5)  }
  0x6b   :  { %334 = vsyncmov [#allocation2 + $0x3] }
  0x6e   :  { %s335_s18 = vpop.sfrf %334 }
  0x6f   :  { %p378_p6 = scmp.ne.s32.totalorder %s335_s18, 0 }
  0x71   :  { %339 = shalt.err (%p378_p6)  }
  0x72   :  { %341 = vsyncmov [#allocation2 + $0x4] }
  0x75   :  { %s342_s6 = vpop.sfrf %341 }
  0x76   :  { %p379_p7 = scmp.ne.s32.totalorder %s342_s6, 0 }
  0x78   :  { %346 = shalt.err (%p379_p7)  }
  0x79   :  { %348 = vsyncmov [#allocation2 + $0x5] }
  0x7c   :  { %s349_s0 = vpop.sfrf %348 }
  0x7d   :  { %p380_p8 = scmp.ne.s32.totalorder %s349_s0, 0 }
  0x7f   :  { %353 = shalt.err (%p380_p8)  }
  0x80   :  { %355 = vsyncmov [#allocation2 + $0x6] }
  0x83   :  { %s356_s1 = vpop.sfrf %355 }
  0x84   :  { %p381_p9 = scmp.ne.s32.totalorder %s356_s1, 0 }
  0x86   :  { %360 = shalt.err (%p381_p9)  }
  0x87   :  { %362 = vsyncmov [#allocation2 + $0x7] }
  0x8a   :  { %s363_s2 = vpop.sfrf %362 }
  0x8b   :  { %p382_p10 = scmp.ne.s32.totalorder %s363_s2, 0 }
  0x8d   :  { %367 = shalt.err (%p382_p10)  }

</bundles_post_ra>
